<compile_context>
chip_gen: v6e
topology: v6e:2x2x1
jax: 0.10.0
libtpu: 0.0.40
codegen_flags: <defaults>
</compile_context>

<pallas_src>
import jax
import jax.numpy as jnp
from jax import lax
from jax.experimental import pallas as pl
from jax.experimental.pallas import tpu as pltpu


def _skip_conv1d_kernel(x_ref, w_ref, b_ref, o_ref):
    """Fused y = x + conv1d(x) for one batch group.

    x_ref: (Bg, C, L)   f32 input, NCW layout (L on the lane axis, multiple of 128)
    w_ref: (C, K*C)     bf16 fused conv weights, column index = k * C + ci
    b_ref: (C, 1)       f32 bias
    o_ref: (Bg, C, L)   output
    """
    Bg, C, L = x_ref.shape
    KC = w_ref.shape[1]
    K = KC // C
    pad = (K - 1) // 2
    N = Bg * L

    # Un-shifted tile with the batch merged into the lane axis: (C, Bg*L), f32.
    # Lane-aligned concat (L is a multiple of 128); this is also the residual.
    if Bg == 1:
        x2 = x_ref[0]
    else:
        x2 = jnp.concatenate([x_ref[b] for b in range(Bg)], axis=-1)

    # Per-batch local lane index (periodic 0..L-1) used for the 'same' padding mask.
    lane = lax.broadcasted_iota(jnp.int32, (C, N), 1)
    if Bg == 1:
        local = lane
    elif (L & (L - 1)) == 0:
        local = lane & (L - 1)          # power-of-two L: cheap bitwise AND
    else:
        local = lane % L

    # im2col: K lane-rotated copies of x2 (pltpu.roll -> XLU), masked at each batch
    # segment boundary.  The mask simultaneously implements the 'same' zero padding
    # and removes cross-batch contamination from the rotation wrap-around.
    # Taps are cast to bf16 as they are built to bound live ranges.
    taps = []
    for k in range(K):
        shift = pad - k                  # tap_k[l] = x[l + k - pad]
        if shift % N == 0:
            t = x2
        else:
            t = pltpu.roll(x2, shift % N, axis=1)
            if shift > 0:
                t = jnp.where(local >= shift, t, 0.0)
            else:
                t = jnp.where(local < L + shift, t, 0.0)
        taps.append(t.astype(jnp.bfloat16))
    xcol = jnp.concatenate(taps, axis=0)          # (K*C, Bg*L) bf16

    # Single MXU contraction over all K taps and the whole batch group (f32 accumulate).
    # NOTE(v5e): with its 128x128 MXU and bf16-less VPU, K accumulated per-tap
    # (C,C)@(C,L) matmuls on the rolled taps (skipping the xcol materialization) may
    # win there; profile if v5e becomes the deployment target.
    conv = jnp.dot(w_ref[...], xcol, preferred_element_type=jnp.float32)   # (C, N) f32

    # Skip connection + bias in f32; the bias broadcast happens exactly once.
    y = x2 + conv + b_ref[...]

    # Lane-dense, aligned stores (L multiple of 128; slice offsets are multiples of L).
    for b in range(Bg):
        o_ref[b] = y[:, b * L:(b + 1) * L].astype(o_ref.dtype)


def pack_skip_conv1d_params(weight, bias):
    """Repack PyTorch Conv1d params for the kernel.  Call ONCE at parameter-load time.

    weight: (C_out, C_in, K) -> (C_out, K*C_in) bf16, column index = k * C_in + ci
    bias:   (C,)             -> (C, 1) f32
    """
    C_out, C_in, K = weight.shape
    if C_out != C_in:
        raise ValueError("SkipConnection requires C_out == C_in")
    if K % 2 != 1:
        raise ValueError("'same' padding split implemented for odd K only "
                         "(PyTorch splits even K asymmetrically)")
    w_flat = jnp.transpose(weight, (0, 2, 1)).reshape(C_out, K * C_in).astype(jnp.bfloat16)
    b_col = bias.reshape(C_out, 1).astype(jnp.float32)
    return w_flat, b_col


def skip_connection_conv1d(x_ncw, w_flat, b_col, *, num_groups=1):
    """y = x + Conv1d(x), padding='same', stride=1, dilation=1 (PyTorch semantics).

    x_ncw:         (B, C, L) f32, PyTorch NCW layout.  L must be a multiple of 128 so
                   all loads/stores are lane-dense and unmasked.
    w_flat, b_col: outputs of pack_skip_conv1d_params() (computed once at init).
    num_groups:    grid steps over the batch.  1 => one fused matmul over all B*L lanes
                   (best on single-TensorCore v5e/v6e).  Use 2 on v7x so the "parallel"
                   batch axis shards across both TensorCores.
    """
    B, C, L = x_ncw.shape
    if w_flat.shape[0] != C or w_flat.shape[1] % C != 0:
        raise ValueError("w_flat shape does not match the channel count of x")
    KC = w_flat.shape[1]
    K = KC // C
    if L % 128 != 0:
        raise ValueError("L must be a multiple of 128 for lane-dense, unmasked stores")
    if num_groups < 1 or B % num_groups != 0:
        raise ValueError("num_groups must divide the batch size")
    Bg = B // num_groups

    # Whole-group block must fit comfortably in scoped VMEM on every generation.
    # Rough budget: double-buffered f32 in+out blocks + bf16 im2col + f32 conv/residual.
    vmem_bytes = (2 * 2 * Bg * C * L * 4) + (Bg * KC * L * 2) + (2 * Bg * C * L * 4)
    if vmem_bytes > 24 * 1024 * 1024:
        # NOTE: for long sequences, tile L with a (K-1) halo (element-offset index map),
        # and re-derive the tile per generation: v7x has 64 MiB physical / 32 MiB default
        # scoped VMEM (roughly halve the v6e tile, but keep >= 512 lanes); set
        # vmem_limit_bytes explicitly via pltpu.CompilerParams when raising the budget.
        raise ValueError(
            f"Batch-group block needs ~{vmem_bytes // 1024} KiB of VMEM; tile L with a "
            "(K-1) halo instead of processing the full sequence in one block.")

    return pl.pallas_call(
        _skip_conv1d_kernel,
        out_shape=jax.ShapeDtypeStruct((B, C, L), x_ncw.dtype),
        grid=(num_groups,),
        in_specs=[
            pl.BlockSpec((Bg, C, L), lambda g: (g, 0, 0)),   # un-padded input, single stream
            pl.BlockSpec((C, KC), lambda g: (0, 0)),         # fused bf16 weights
            pl.BlockSpec((C, 1), lambda g: (0, 0)),          # f32 bias
        ],
        out_specs=pl.BlockSpec((Bg, C, L), lambda g: (g, 0, 0)),
        compiler_params=pltpu.CompilerParams(
            dimension_semantics=("parallel",)),               # groups independent; shards on v7x
    )(x_ncw, w_flat, b_col)


def _reference(x_ncw, weight, bias):
    """Pure-JAX reference: x + conv1d(x), padding='same' (PyTorch semantics, odd K)."""
    K = weight.shape[-1]
    pad_left = (K - 1) // 2
    pad_right = K - 1 - pad_left
    conv = lax.conv_general_dilated(
        x_ncw, weight,
        window_strides=(1,),
        padding=[(pad_left, pad_right)],
        dimension_numbers=("NCH", "OIH", "NCH"),
    ) + bias.reshape(1, -1, 1)
    return x_ncw + conv


if __name__ == "__main__":
    # Small shapes consistent with the module: batch=2, channels=32, conv kernel K=3,
    # L=256 so the lane (last) axis is a multiple of 128.
    B, C, L, K = 2, 32, 256, 3

    key = jax.random.PRNGKey(0)
    kx, kw, kb = jax.random.split(key, 3)
    x = jax.random.normal(kx, (B, C, L), dtype=jnp.float32)
    # Deterministic parameter init (PyTorch Conv1d shapes: (C_out, C_in, K), (C,)).
    fan_in = C * K
    bound = 1.0 / (fan_in ** 0.5)
    weight = jax.random.uniform(kw, (C, C, K), jnp.float32, -bound, bound)
    bias = jax.random.uniform(kb, (C,), jnp.float32, -bound, bound)

    # Parameter repack happens once, at "load time".
    w_flat, b_col = pack_skip_conv1d_params(weight, bias)

    # Default path (v5e/v6e): single fused matmul over the whole batch, grid=(1,).
    y1 = skip_connection_conv1d(x, w_flat, b_col)
    # v7x path: batch split into 2 independent "parallel" grid steps (one per TensorCore).
    y2 = skip_connection_conv1d(x, w_flat, b_col, num_groups=2)
    jax.block_until_ready((y1, y2))

    y_ref = _reference(x, weight, bias)
    assert y1.shape == (B, C, L) and y2.shape == (B, C, L)
    # bf16 MXU operands (f32 accumulate) -> slightly looser tolerance than pure f32.
    assert jnp.allclose(y1, y_ref, atol=5e-2, rtol=5e-2), "mismatch vs reference (fused)"
    assert jnp.allclose(y2, y_ref, atol=5e-2, rtol=5e-2), "mismatch vs reference (batch-parallel)"

    print("KERNEL_OK")
</pallas_src>

<mosaic_0001>
module attributes {stable_mosaic.version = 11 : i64} {
  func.func @_skip_conv1d_kernel(%arg0: i32, %arg1: memref<2x32x256xf32, #tpu.memory_space<vmem>>, %arg2: memref<32x96xbf16, #tpu.memory_space<vmem>>, %arg3: memref<32x1xf32, #tpu.memory_space<vmem>>, %arg4: memref<2x32x256xf32, #tpu.memory_space<vmem>>) attributes {dimension_semantics = [#tpu.dimension_semantics<parallel>], iteration_bounds = array<i64: 1>, scalar_prefetch = 0 : i64, scratch_operands = 0 : i64, tpu.core_type = #tpu.core_type<tc>, window_params = [{transform_indices = @transform_0, window_bounds = array<i64: 2, 32, 256>}, {pipeline_mode = #tpu.pipeline_mode<synchronous>, transform_indices = @transform_1, window_bounds = array<i64: 32, 96>}, {pipeline_mode = #tpu.pipeline_mode<synchronous>, transform_indices = @transform_2, window_bounds = array<i64: 32, 1>}, {transform_indices = @transform_3, window_bounds = array<i64: 2, 32, 256>}]} {
    %c0 = arith.constant 0 : index
    %c0_0 = arith.constant 0 : index
    %c0_1 = arith.constant 0 : index
    %0 = vector.load %arg1[%c0, %c0_0, %c0_1] : memref<2x32x256xf32, #tpu.memory_space<vmem>>, vector<1x32x256xf32>
    %1 = vector.shape_cast %0 : vector<1x32x256xf32> to vector<32x256xf32>
    %c1 = arith.constant 1 : index
    %c0_2 = arith.constant 0 : index
    %c0_3 = arith.constant 0 : index
    %2 = vector.load %arg1[%c1, %c0_2, %c0_3] : memref<2x32x256xf32, #tpu.memory_space<vmem>>, vector<1x32x256xf32>
    %3 = vector.shape_cast %2 : vector<1x32x256xf32> to vector<32x256xf32>
    %4 = tpu.concatenate %1, %3 in 1 : vector<32x256xf32>, vector<32x256xf32> -> vector<32x512xf32>
    %5 = tpu.iota {dimensions = array<i32: 1>} : vector<32x512xi32>
    %c255_i32 = arith.constant 255 : i32
    %6 = vector.broadcast %c255_i32 : i32 to vector<32x512xi32>
    %7 = arith.andi %5, %6 : vector<32x512xi32>
    %c1_i32 = arith.constant 1 : i32
    %8 = tpu.dynamic_rotate %4 by %c1_i32 dim 1 : vector<32x512xf32>, i32 -> vector<32x512xf32>
    %c1_i32_4 = arith.constant 1 : i32
    %9 = vector.broadcast %c1_i32_4 : i32 to vector<32x512xi32>
    %10 = arith.cmpi sge, %7, %9 : vector<32x512xi32>
    %cst = arith.constant 0.000000e+00 : f32
    %11 = vector.broadcast %cst : f32 to vector<32x512xf32>
    %12 = arith.select %10, %8, %11 : vector<32x512xi1>, vector<32x512xf32>
    %13 = arith.truncf %12 : vector<32x512xf32> to vector<32x512xbf16>
    %14 = arith.truncf %4 : vector<32x512xf32> to vector<32x512xbf16>
    %c511_i32 = arith.constant 511 : i32
    %15 = tpu.dynamic_rotate %4 by %c511_i32 dim 1 : vector<32x512xf32>, i32 -> vector<32x512xf32>
    %c255_i32_5 = arith.constant 255 : i32
    %16 = vector.broadcast %c255_i32_5 : i32 to vector<32x512xi32>
    %17 = arith.cmpi slt, %7, %16 : vector<32x512xi32>
    %cst_6 = arith.constant 0.000000e+00 : f32
    %18 = vector.broadcast %cst_6 : f32 to vector<32x512xf32>
    %19 = arith.select %17, %15, %18 : vector<32x512xi1>, vector<32x512xf32>
    %20 = arith.truncf %19 : vector<32x512xf32> to vector<32x512xbf16>
    %21 = tpu.concatenate %13, %14, %20 in 0 : vector<32x512xbf16>, vector<32x512xbf16>, vector<32x512xbf16> -> vector<96x512xbf16>
    %c0_7 = arith.constant 0 : index
    %c0_8 = arith.constant 0 : index
    %22 = vector.load %arg2[%c0_7, %c0_8] : memref<32x96xbf16, #tpu.memory_space<vmem>>, vector<32x96xbf16>
    %cst_9 = arith.constant dense<0.000000e+00> : vector<32x512xf32>
    %23 = tpu.matmul %22, %21, %cst_9 {dimension_numbers = #tpu.dot_dimension_numbers<[1], [0], [0], [1], [0, 0, 1, 1], [], []>} : vector<32x96xbf16>, vector<96x512xbf16>, vector<32x512xf32> -> vector<32x512xf32>
    %24 = arith.addf %4, %23 : vector<32x512xf32>
    %c0_10 = arith.constant 0 : index
    %c0_11 = arith.constant 0 : index
    %25 = vector.load %arg3[%c0_10, %c0_11] : memref<32x1xf32, #tpu.memory_space<vmem>>, vector<32x1xf32>
    %26 = vector.broadcast %25 : vector<32x1xf32> to vector<32x512xf32>
    %27 = arith.addf %24, %26 : vector<32x512xf32>
    %28 = vector.extract_strided_slice %27 {offsets = [0, 0], sizes = [32, 256], strides = [1, 1]} : vector<32x512xf32> to vector<32x256xf32>
    %c0_12 = arith.constant 0 : index
    %c0_13 = arith.constant 0 : index
    %c0_14 = arith.constant 0 : index
    %29 = vector.load %arg4[%c0_12, %c0_13, %c0_14] : memref<2x32x256xf32, #tpu.memory_space<vmem>>, vector<1x32x256xf32>
    %30 = vector.shape_cast %29 : vector<1x32x256xf32> to vector<32x256xf32>
    %31 = vector.shape_cast %28 : vector<32x256xf32> to vector<1x32x256xf32>
    tpu.vector_store %arg4[%c0_12, %c0_13, %c0_14], %31 {strides = array<i32>} : memref<2x32x256xf32, #tpu.memory_space<vmem>>, vector<1x32x256xf32>,
    %32 = vector.extract_strided_slice %27 {offsets = [0, 256], sizes = [32, 256], strides = [1, 1]} : vector<32x512xf32> to vector<32x256xf32>
    %c1_15 = arith.constant 1 : index
    %c0_16 = arith.constant 0 : index
    %c0_17 = arith.constant 0 : index
    %33 = vector.load %arg4[%c1_15, %c0_16, %c0_17] : memref<2x32x256xf32, #tpu.memory_space<vmem>>, vector<1x32x256xf32>
    %34 = vector.shape_cast %33 : vector<1x32x256xf32> to vector<32x256xf32>
    %35 = vector.shape_cast %32 : vector<32x256xf32> to vector<1x32x256xf32>
    tpu.vector_store %arg4[%c1_15, %c0_16, %c0_17], %35 {strides = array<i32>} : memref<2x32x256xf32, #tpu.memory_space<vmem>>, vector<1x32x256xf32>,
    return
  }
  func.func @transform_0(%arg0: i32) -> (i32, i32, i32) {
    %c0_i32 = arith.constant 0 : i32
    %c0_i32_0 = arith.constant 0 : i32
    %c0_i32_1 = arith.constant 0 : i32
    return %arg0, %c0_i32, %c0_i32_0 : i32, i32, i32
  }
  func.func @transform_1(%arg0: i32) -> (i32, i32) {
    %c0_i32 = arith.constant 0 : i32
    %c0_i32_0 = arith.constant 0 : i32
    %c0_i32_1 = arith.constant 0 : i32
    return %c0_i32, %c0_i32_0 : i32, i32
  }
  func.func @transform_2(%arg0: i32) -> (i32, i32) {
    %c0_i32 = arith.constant 0 : i32
    %c0_i32_0 = arith.constant 0 : i32
    %c0_i32_1 = arith.constant 0 : i32
    return %c0_i32, %c0_i32_0 : i32, i32
  }
  func.func @transform_3(%arg0: i32) -> (i32, i32, i32) {
    %c0_i32 = arith.constant 0 : i32
    %c0_i32_0 = arith.constant 0 : i32
    %c0_i32_1 = arith.constant 0 : i32
    return %arg0, %c0_i32, %c0_i32_0 : i32, i32, i32
  }
}

</mosaic_0001>

<bundles_post_ra>
// kernel: tpu_custom_call.1
= control target key start
LH: loop header
LB: loop body
LE: loop exit
PB: predicated region body
PF: predicated region fallthrough
CT: control target
= control target key end

     0   :  { %8 = vsyncpa [#allocation3], 0  ;;  %s883_s0 = inlined_call_operand.hbm [shape: f32[2,32,256], index: 0, kind: input, shape index: {}]   ;;  %s884_s1 = inlined_call_operand.vmem [shape: bf16[32,96], index: 1, kind: input, shape index: {}]   ;;  %s885_s2 = inlined_call_operand.vmem [shape: f32[32,1], index: 2, kind: input, shape index: {}]   ;;  %s886_s3 = inlined_call_operand.hbm [shape: f32[2,32,256], index: 3, kind: output, shape index: {}]  }
   0x1   :  { %9 = vsyncpa [#allocation4], 0  ;;  %s600_s12 = smov [#allocation2]  }
   0x2   :  { %s15_s13 = sshll.u32 %s600_s12, 4  ;;  %s16_s13 = int_to_ptr.vmem [resolvable:$true] %s15_s13 }
   0x3   :  { %s564_s14 = scalar_lea.vmem %s16_s13, 2048  ;;  %p569_p1 = scmp.lt.s32.totalorder %s16_s13, %s16_s13 }
   0x4   :  { %p565_p0 = scmp.ne.s32.totalorder %s16_s13, %s564_s14  ;;  %p570_p2 = scmp.lt.s32.totalorder %s564_s14, %s564_s14 }
   0x6   :  { %p571_p3 = por %p570_p2, %p569_p1 }
   0x8   :  { %p572_p4 = pnand %p571_p3, %p565_p0 }
   0xa   :  { %575 = shalt.err (!%p572_p4)
}
   0xb   :  { %s601_s15 = smov 256   ;;  %s602_s16 = smov 16  }
   0xc   :  { %21 = dma.hbm_to_vmem [thread:$0]  %s883_s0, 2048, %s16_s13, [#allocation3], %s601_s15, %s601_s15, %s602_s16  }
   0xd   :  { %596 = dma.done.wait [#allocation3], 2048  }
   0xe   :  { %597 = vsyncadd [#allocation3], 4294965248  ;;  %v633_v0 = vld [vmem:[#allocation2 + $0x60] sm:$0xff]  ;;  %v635_v1 = vld [vmem:[#allocation2 + $0x70] sm:$0xff]  ;;  %s603_s0 = smov 127   ;;  %s604_s19 = smov 1   ;;  %v47_v29 = vlaneseq }
   0xf   :  { %v637_v2 = vld [vmem:[#allocation2 + $0x20] sm:$0xff]  ;;  %v482_v3 = vpack.i.bf16 %v635_v1, %v633_v0  ;;  %v641_v4 = vld [vmem:[#allocation2 + $0x30] sm:$0xff]  ;;  %v643_v5 = vld [vmem:[#allocation2 + $0x68] sm:$0xff]  ;;  %v605_v24 = vmov 0   ;;  %vm232_vm10 = vcmask 785408  }
  0x10   :  { %v645_v6 = vld [vmem:[#allocation2 + $0x78] sm:$0xff]  ;;  %v472_v7 = vpack.i.bf16 %v641_v4, %v637_v2  ;;  %v649_v8 = vld [vmem:[#allocation2 + $0x28] sm:$0xff]  ;;  %v661_v14 = vld [vmem:[#allocation2] sm:$0xff]  ;;  %271 = vmatprep.mubr.bf16.mxu0 %v605_v24  ;;  %324 = vmatprep.mubr.bf16.mxu1 %v605_v24  ;;  %v697_v30 = vand.u32 127, %v47_v29 }
  0x11   :  { %v651_v9 = vld [vmem:[#allocation2 + $0x38] sm:$0xff]  ;;  %483 = vrot.lane.b32.xlu1 %v482_v3, %s603_s0  ;;  %v487_v10 = vpack.i.bf16 %v645_v6, %v643_v5  ;;  %v657_v12 = vld [vmem:[#allocation2 + $0x8] sm:$0xff]  ;;  %v663_v15 = vld [vmem:[#allocation2 + $0x10] sm:$0xff]  ;;  %552 = vset.pattern.permute.xlu0 %v605_v24 }
  0x12   :  { %473 = vrot.lane.b32.xlu0 %v472_v7, %s603_s0  ;;  %v477_v11 = vpack.i.bf16 %v651_v9, %v649_v8  ;;  %v659_v13 = vld [vmem:[#allocation2 + $0x18] sm:$0xff]  ;;  %v492_v17 = vpack.i.bf16 %v663_v15, %v661_v14  ;;  %v669_v18 = vld [vmem:[#allocation2 + $0x48] sm:$0xff]  ;;  %v673_v20 = vld [vmem:[#allocation2 + $0x40] sm:$0xff]  ;;  %553 = vset.pattern.permute.xlu1 %v605_v24  ;;  %v49_v31 = vadd.s32 128, %v697_v30  ;;  %v51_v32 = vadd.s32 384, %v697_v30 }
  0x13   :  { %v497_v16 = vpack.i.bf16 %v659_v13, %v657_v12  ;;  %v671_v19 = vld [vmem:[#allocation2 + $0x58] sm:$0xff]  ;;  %v675_v21 = vld [vmem:[#allocation2 + $0x50] sm:$0xff]  ;;  %v361_v25 = vld [vmem:[%s885_s2] sm:$0xff]  ;;  %vm173_vm0 = vcmp.lt.s32.totalorder %v697_v30, 127  ;;  %vm88_vm5 = vcmp.lt.s32.totalorder %v697_v30, 1  ;;  %v52_v41 = vand.u32 255, %v697_v30 }
  0x14   :  { %v507_v22 = vpack.i.bf16 %v671_v19, %v669_v18  ;;  %v502_v23 = vpack.i.bf16 %v675_v21, %v673_v20  ;;  %v362_v26 = vld [vmem:[%s885_s2 + $0x8] sm:$0xff]  ;;  %v363_v27 = vld [vmem:[%s885_s2 + $0x10] sm:$0xff]  ;;  %v364_v28 = vld [vmem:[%s885_s2 + $0x18] sm:$0xff]  ;;  %v53_v34 = vand.u32 255, %v49_v31  ;;  %v55_v35 = vand.u32 255, %v51_v32 }
  0x15   :  { %488 = vrot.lane.b32.xlu1 %v487_v10, %s603_s0  ;;  %v140_v32 = vpack.c.bf16 %v645_v6, %v643_v5  ;;  %v134_v40 = vpack.c.bf16 %v659_v13, %v657_v12  ;;  %vm791_vm6 = vcmp.ge.s32.totalorder %v52_v41, 1 }
  0x16   :  { %478 = vrot.lane.b32.xlu0 %v477_v11, %s603_s0  ;;  %vm702_vm1 = vcmp.lt.s32.totalorder %v53_v34, 255  ;;  %vm706_vm2 = vcmp.lt.s32.totalorder %v55_v35, 255  ;;  %vm443_vm8 = vmpackc.low %vm791_vm6, %vm791_vm6 }
  0x17   :  { %vm451_vm3 = vmpackc.low %vm706_vm2, %vm706_vm2 }
  0x18   :  { %vm437_vm4 = vmpackc.low %vm702_vm1, %vm702_vm1 }
  0x19   :  { %498 = vrot.lane.b32.xlu1 %v497_v16, %s603_s0 }
  0x1a   :  { %493 = vrot.lane.b32.xlu0 %v492_v17, %s603_s0 }
  0x1d   :  { %508 = vrot.lane.b32.xlu1 %v507_v22, %s603_s0 }
  0x1e   :  { %503 = vrot.lane.b32.xlu0 %v502_v23, %s603_s0 }
  0x21   :  { %518 = vrot.lane.b32.xlu1 %v477_v11, %s604_s19 }
  0x22   :  { %513 = vrot.lane.b32.xlu0 %v472_v7, %s604_s19 }
  0x25   :  { %528 = vrot.lane.b32.xlu1 %v487_v10, %s604_s19 }
  0x26   :  { %523 = vrot.lane.b32.xlu0 %v482_v3, %s604_s19 }
  0x29   :  { %538 = vrot.lane.b32.xlu1 %v497_v16, %s604_s19 }
  0x2a   :  { %533 = vrot.lane.b32.xlu0 %v492_v17, %s604_s19 }
  0x2d   :  { %548 = vrot.lane.b32.xlu1 %v507_v22, %s604_s19 }
  0x2e   :  { %543 = vrot.lane.b32.xlu0 %v502_v23, %s604_s19  ;;  %v138_v23 = vpack.c.bf16 %v651_v9, %v649_v8 }
  0x31   :  { %372 = vperm.xlu1 %553, %v362_v26  }
  0x32   :  { %367 = vperm.xlu0 %552, %v361_v25  }
  0x35   :  { %377 = vperm.xlu1 %553, %v363_v27  }
  0x36   :  { %382 = vperm.xlu0 %552, %v364_v28  }
  0x83   :  { %v484_v33 = vpop.permute.xlu1 %483 }
  0x84   :  { %v474_v36 = vpop.permute.xlu0 %473  ;;  %v486_v37 = vunpack.i.h.bf16 %v484_v33  ;;  %v485_v38 = vunpack.i.l.bf16 %v484_v33  ;;  %v50_v33 = vadd.s32 256, %v697_v30  ;;  %v555_v30 = vld [vmem:[%s884_s1 + $0x8] sm:$0xff]  }
  0x85   :  { %v476_v42 = vunpack.i.h.bf16 %v474_v36  ;;  %v475_v43 = vunpack.i.l.bf16 %v474_v36 }
  0x87   :  { %v489_v39 = vpop.permute.xlu1 %488 }
  0x88   :  { %v491_v44 = vunpack.i.h.bf16 %v489_v39  ;;  %v490_v45 = vunpack.i.l.bf16 %v489_v39  ;;  %v479_v46 = vpop.permute.xlu0 %478 }
  0x89   :  { %v481_v47 = vunpack.i.h.bf16 %v479_v46  ;;  %v480_v48 = vunpack.i.l.bf16 %v479_v46 }
  0x8a   :  { %v188_v49 = vsel %vm173_vm0, %v490_v45, %v475_v43  ;;  %v189_v50 = vsel %vm173_vm0, %v491_v44, %v476_v42  ;;  %v176_v51 = vsel %vm173_vm0, %v485_v38, %v490_v45  ;;  %v177_v52 = vsel %vm173_vm0, %v486_v37, %v491_v44 }
  0x8b   :  { %v499_v53 = vpop.permute.xlu1 %498  ;;  %v180_v54 = vsel %vm173_vm0, %v480_v48, %v485_v38  ;;  %v181_v55 = vsel %vm173_vm0, %v481_v47, %v486_v37  ;;  %v452_v56 = vpack.c.bf16 %v189_v50, %v188_v49  ;;  %v184_v57 = vsel %vm173_vm0, %v475_v43, %v480_v48 }
  0x8c   :  { %v501_v58 = vunpack.i.h.bf16 %v499_v53  ;;  %v500_v59 = vunpack.i.l.bf16 %v499_v53  ;;  %v494_v60 = vpop.permute.xlu0 %493  ;;  %v438_v61 = vpack.c.bf16 %v181_v55, %v180_v54  ;;  %v185_v62 = vsel %vm173_vm0, %v476_v42, %v481_v47 }
  0x8d   :  { %v496_v63 = vunpack.i.h.bf16 %v494_v60  ;;  %v495_v3 = vunpack.i.l.bf16 %v494_v60  ;;  %453 = vmatprep.subr.msk.bf16.mxu1 %vm451_vm3, %v452_v56  ;;  %v214_v7 = vpack.c.bf16 %v185_v62, %v184_v57  ;;  %v216_v10 = vpack.c.bf16 %v177_v52, %v176_v51 }
  0x8e   :  { %439 = vmatprep.subr.msk.bf16.mxu0 %vm437_vm4, %v438_v61  ;;  %v137_v51 = vpack.c.bf16 %v641_v4, %v637_v2  ;;  %v139_v52 = vpack.c.bf16 %v635_v1, %v633_v0  ;;  %v54_v53 = vand.u32 255, %v50_v33  ;;  %v136_v56 = vpack.c.bf16 %v671_v19, %v669_v18 }
  0x8f   :  { %244 = vmatpush1.bf16.msra.mxu0 %v214_v7  ;;  %297 = vmatpush1.bf16.msra.mxu1 %v216_v10  ;;  %v509_v11 = vpop.permute.xlu1 %508  ;;  %v182_v27 = vsel %vm173_vm0, %v495_v3, %v500_v59  ;;  %v183_v28 = vsel %vm173_vm0, %v496_v63, %v501_v58 }
  0x90   :  { %v511_v16 = vunpack.i.h.bf16 %v509_v11  ;;  %v510_v17 = vunpack.i.l.bf16 %v509_v11  ;;  %v504_v22 = vpop.permute.xlu0 %503  ;;  %v210_v44 = vpack.c.bf16 %v183_v28, %v182_v27  ;;  %vm795_vm7 = vcmp.ge.s32.totalorder %v54_v53, 1 }
  0x91   :  { %v506_v25 = vunpack.i.h.bf16 %v504_v22  ;;  %v505_v26 = vunpack.i.l.bf16 %v504_v22  ;;  %vm457_vm9 = vmpackc.low %vm795_vm7, %vm795_vm7 }
  0x92   :  { %v186_v29 = vsel %vm173_vm0, %v510_v17, %v495_v3  ;;  %v187_v31 = vsel %vm173_vm0, %v511_v16, %v496_v63  ;;  %v133_v63 = vpack.c.bf16 %v663_v15, %v661_v14  ;;  %v135_v3 = vpack.c.bf16 %v675_v21, %v673_v20 }
  0x93   :  { %v455_v34 = vpack.c.bf16 %v187_v31, %v186_v29  ;;  %v179_v35 = vsel %vm173_vm0, %v501_v58, %v506_v25  ;;  %v178_v36 = vsel %vm173_vm0, %v500_v59, %v505_v26  ;;  %v519_v37 = vpop.permute.xlu1 %518  ;;  %v174_v38 = vsel %vm173_vm0, %v505_v26, %v510_v17 }
  0x94   :  { %v441_v39 = vpack.c.bf16 %v179_v35, %v178_v36  ;;  %v520_v42 = vunpack.i.l.bf16 %v519_v37  ;;  %v514_v43 = vpop.permute.xlu0 %513  ;;  %v175_v45 = vsel %vm173_vm0, %v506_v25, %v511_v16  ;;  %v521_v46 = vunpack.i.h.bf16 %v519_v37 }
  0x95   :  { %v516_v47 = vunpack.i.h.bf16 %v514_v43  ;;  %v515_v48 = vunpack.i.l.bf16 %v514_v43  ;;  %456 = vmatprep.subr.msk.bf16.mxu1 %vm451_vm3, %v455_v34  ;;  %v212_v49 = vpack.c.bf16 %v175_v45, %v174_v38 }
  0x96   :  { %442 = vmatprep.subr.msk.bf16.mxu0 %vm437_vm4, %v441_v39 }
  0x97   :  { %246 = vmatpush1.bf16.msra.mxu0 %v210_v44  ;;  %299 = vmatpush1.bf16.msra.mxu1 %v212_v49  ;;  %v529_v50 = vpop.permute.xlu1 %528  ;;  %v99_v57 = vsel %vm88_vm5, %v515_v48, %v520_v42  ;;  %v100_v61 = vsel %vm88_vm5, %v516_v47, %v521_v46 }
  0x98   :  { %v530_v54 = vunpack.i.l.bf16 %v529_v50  ;;  %v524_v55 = vpop.permute.xlu0 %523  ;;  %247 = vmatprep.subr.bf16.mxu0 %v138_v23  ;;  %300 = vmatprep.subr.bf16.mxu1 %v140_v32  ;;  %v531_v58 = vunpack.i.h.bf16 %v529_v50  ;;  %v130_v22 = vpack.c.bf16 %v100_v61, %v99_v57 }
  0x99   :  { %v526_v59 = vunpack.i.h.bf16 %v524_v55  ;;  %v525_v60 = vunpack.i.l.bf16 %v524_v55  ;;  %v554_v55 = vld [vmem:[%s884_s1] sm:$0xff]   ;;  %s606_s1 = smov [#allocation5]  }
  0x9a   :  { %v103_v25 = vsel %vm88_vm5, %v530_v54, %v515_v48  ;;  %v104_v29 = vsel %vm88_vm5, %v531_v58, %v516_v47  ;;  %s423_s4 = sshll.u32 %s606_s1, 4  ;;  %s424_s4 = int_to_ptr.vmem [resolvable:$true] %s423_s4 }
  0x9b   :  { %248 = vmatpush1.bf16.msra.mxu0 %v137_v51  ;;  %301 = vmatpush1.bf16.msra.mxu1 %v139_v52  ;;  %v539_v62 = vpop.permute.xlu1 %538  ;;  %v91_v23 = vsel %vm88_vm5, %v525_v60, %v530_v54  ;;  %v92_v28 = vsel %vm88_vm5, %v526_v59, %v531_v58  ;;  %v96_v31 = vsel %vm88_vm5, %v521_v46, %v526_v59  ;;  %s576_s5 = scalar_lea.vmem %s424_s4, 2048  ;;  %p581_p6 = scmp.lt.s32.totalorder %s424_s4, %s424_s4 }
  0x9c   :  { %v541_v11 = vunpack.i.h.bf16 %v539_v62  ;;  %v540_v16 = vunpack.i.l.bf16 %v539_v62  ;;  %v534_v17 = vpop.permute.xlu0 %533  ;;  %249 = vmatprep.subr.bf16.mxu0 %v134_v40  ;;  %302 = vmatprep.subr.bf16.mxu1 %v136_v56  ;;  %v95_v32 = vsel %vm88_vm5, %v520_v42, %v525_v60  ;;  %v132_v33 = vpack.c.bf16 %v92_v28, %v91_v23  ;;  %p577_p5 = scmp.ne.s32.totalorder %s424_s4, %s576_s5  ;;  %p582_p7 = scmp.lt.s32.totalorder %s576_s5, %s576_s5 }
  0x9d   :  { %v536_v26 = vunpack.i.h.bf16 %v534_v17  ;;  %v535_v27 = vunpack.i.l.bf16 %v534_v17  ;;  %v444_v42 = vpack.c.bf16 %v104_v29, %v103_v25  ;;  %v458_v43 = vpack.c.bf16 %v96_v31, %v95_v32 }
  0x9e   :  { %p583_p8 = por %p582_p7, %p581_p6 }
  0x9f   :  { %250 = vmatpush1.bf16.msra.mxu0 %v133_v63  ;;  %303 = vmatpush1.bf16.msra.mxu1 %v135_v3  ;;  %v549_v34 = vpop.permute.xlu1 %548  ;;  %v97_v35 = vsel %vm88_vm5, %v535_v27, %v540_v16  ;;  %v98_v36 = vsel %vm88_vm5, %v536_v26, %v541_v11 }
  0xa0   :  { %v551_v37 = vunpack.i.h.bf16 %v549_v34  ;;  %v550_v38 = vunpack.i.l.bf16 %v549_v34  ;;  %v544_v39 = vpop.permute.xlu0 %543  ;;  %251 = vmatprep.subr.bf16.mxu0 %v130_v22  ;;  %304 = vmatprep.subr.bf16.mxu1 %v132_v33  ;;  %v126_v48 = vpack.c.bf16 %v98_v36, %v97_v35  ;;  %p584_p9 = pnand %p583_p8, %p577_p5 }
  0xa1   :  { %v546_v44 = vunpack.i.h.bf16 %v544_v39  ;;  %v545_v45 = vunpack.i.l.bf16 %v544_v39 }
  0xa2   :  { %v101_v46 = vsel %vm88_vm5, %v550_v38, %v535_v27  ;;  %v102_v47 = vsel %vm88_vm5, %v551_v37, %v536_v26 }
  0xa3   :  { %v447_v49 = vpack.c.bf16 %v102_v47, %v101_v46  ;;  %v94_v50 = vsel %vm88_vm5, %v541_v11, %v546_v44  ;;  %v93_v51 = vsel %vm88_vm5, %v540_v16, %v545_v45  ;;  %445 = vmatpush1.bf16.msk.msra.mxu0 %vm443_vm8, %v444_v42  ;;  %459 = vmatpush1.bf16.msk.msra.mxu1 %vm457_vm9, %v458_v43 }
  0xa4   :  { %v461_v52 = vpack.c.bf16 %v94_v50, %v93_v51  ;;  %253 = vmatprep.subr.bf16.mxu0 %v126_v48  ;;  %v89_v41 = vsel %vm88_vm5, %v545_v45, %v550_v38  ;;  %v90_v53 = vsel %vm88_vm5, %v546_v44, %v551_v37 }
  0xa5   :  { %v128_v54 = vpack.c.bf16 %v90_v53, %v89_v41 }
  0xa7   :  { %306 = vmatprep.subr.bf16.mxu1 %v128_v54  ;;  %448 = vmatpush1.bf16.msk.msra.mxu0 %vm443_vm8, %v447_v49 }
  0xa8   :  { %462 = vmatpush1.bf16.msk.msra.mxu1 %vm457_vm9, %v461_v52 }
  0xaa   :  { %449 = vmatmul.mubr.msk.bf16.vlgmr.msra.gmra.mxu0 %vm232_vm10, %v554_v55 }
  0xab   :  { %463 = vmatmul.mubr.msk.bf16.vlgmr.msra.gmra.mxu1 %vm232_vm10, %v554_v55  ;;  %281 = vmatprep.mubr.bf16.mxu0 %v605_v24 }
  0xac   :  { %334 = vmatprep.mubr.bf16.mxu1 %v605_v24  ;;  %v373_v61 = vpop.permute.xlu1 %372 }
  0xad   :  { %v368_v56 = vpop.permute.xlu0 %367 }
  0xb0   :  { %v378_v28 = vpop.permute.xlu1 %377 }
  0xb1   :  { %v383_v43 = vpop.permute.xlu0 %382 }
  0xb2   :  { %450 = vmatmul.mubr.msk.bf16.gmra.mxu0 %vm232_vm10, %v555_v30 }
  0xb3   :  { %464 = vmatmul.mubr.msk.bf16.gmra.mxu1 %vm232_vm10, %v555_v30 }
 0x16a   :  { %v273_v40 = vpop.f32.mrf.mxu0 }
 0x16b   :  { %v345_v57 = vadd.f32 %v273_v40, %v661_v14  ;;  %v326_v58 = vpop.f32.mrf.mxu1 }
 0x16c   :  { %v347_v59 = vadd.f32 %v326_v58, %v673_v20  ;;  %v275_v60 = vpop.f32.mrf.mxu0 }
 0x16d   :  { %v385_v62 = vadd.f32 %v368_v56, %v345_v57  ;;  %v346_v63 = vadd.f32 %v275_v60, %v657_v12  ;;  %v328_v3 = vpop.f32.mrf.mxu1 }
 0x16e   :  { %v387_v24 = vadd.f32 %v368_v56, %v347_v59  ;;  %v348_v7 = vadd.f32 %v328_v3, %v669_v18  ;;  %v277_v10 = vpop.f32.mrf.mxu0 }
 0x16f   :  { %401 = vst [vmem:[#allocation5] sm:$0xff] %v385_v62  ;;  %v386_v11 = vadd.f32 %v368_v56, %v346_v63  ;;  %v349_v16 = vadd.f32 %v277_v10, %v663_v15  ;;  %v330_v17 = vpop.f32.mrf.mxu1 }
 0x170   :  { %410 = vst [vmem:[#allocation5 + $0x40] sm:$0xff] %v387_v24  ;;  %v388_v14 = vadd.f32 %v368_v56, %v348_v7  ;;  %v351_v22 = vadd.f32 %v330_v17, %v675_v21  ;;  %v279_v20 = vpop.f32.mrf.mxu0 }
 0x171   :  { %402 = vst [vmem:[#allocation5 + $0x8] sm:$0xff] %v386_v11  ;;  %v389_v23 = vadd.f32 %v373_v61, %v349_v16  ;;  %v350_v25 = vadd.f32 %v279_v20, %v659_v13  ;;  %v332_v12 = vpop.f32.mrf.mxu1 }
 0x172   :  { %411 = vst [vmem:[#allocation5 + $0x48] sm:$0xff] %v388_v14  ;;  %v391_v26 = vadd.f32 %v373_v61, %v351_v22  ;;  %v352_v18 = vadd.f32 %v332_v12, %v671_v19  ;;  %v283_v27 = vpop.f32.mrf.mxu0 }
 0x173   :  { %403 = vst [vmem:[#allocation5 + $0x10] sm:$0xff] %v389_v23  ;;  %v390_v29 = vadd.f32 %v373_v61, %v350_v25  ;;  %v353_v15 = vadd.f32 %v283_v27, %v637_v2  ;;  %v336_v31 = vpop.f32.mrf.mxu1 }
 0x174   :  { %412 = vst [vmem:[#allocation5 + $0x50] sm:$0xff] %v391_v26  ;;  %v392_v32 = vadd.f32 %v373_v61, %v352_v18  ;;  %v355_v21 = vadd.f32 %v336_v31, %v633_v0  ;;  %v285_v33 = vpop.f32.mrf.mxu0 }
 0x175   :  { %404 = vst [vmem:[#allocation5 + $0x18] sm:$0xff] %v390_v29  ;;  %v393_v34 = vadd.f32 %v378_v28, %v353_v15  ;;  %v354_v13 = vadd.f32 %v285_v33, %v649_v8  ;;  %v338_v35 = vpop.f32.mrf.mxu1 }
 0x176   :  { %413 = vst [vmem:[#allocation5 + $0x58] sm:$0xff] %v392_v32  ;;  %v395_v36 = vadd.f32 %v378_v28, %v355_v21  ;;  %v356_v19 = vadd.f32 %v338_v35, %v643_v5  ;;  %v287_v37 = vpop.f32.mrf.mxu0 }
 0x177   :  { %405 = vst [vmem:[#allocation5 + $0x20] sm:$0xff] %v393_v34  ;;  %v394_v38 = vadd.f32 %v378_v28, %v354_v13  ;;  %v357_v2 = vadd.f32 %v287_v37, %v641_v4  ;;  %v340_v39 = vpop.f32.mrf.mxu1 }
 0x178   :  { %414 = vst [vmem:[#allocation5 + $0x60] sm:$0xff] %v395_v36  ;;  %v396_v42 = vadd.f32 %v378_v28, %v356_v19  ;;  %v359_v0 = vadd.f32 %v340_v39, %v635_v1  ;;  %v289_v44 = vpop.f32.mrf.mxu0 }
 0x179   :  { %406 = vst [vmem:[#allocation5 + $0x28] sm:$0xff] %v394_v38  ;;  %v397_v45 = vadd.f32 %v383_v43, %v357_v2  ;;  %v358_v8 = vadd.f32 %v289_v44, %v651_v9  ;;  %v342_v46 = vpop.f32.mrf.mxu1 }
 0x17a   :  { %415 = vst [vmem:[#allocation5 + $0x68] sm:$0xff] %v396_v42  ;;  %v399_v5 = vadd.f32 %v383_v43, %v359_v0  ;;  %v360_v47 = vadd.f32 %v342_v46, %v645_v6 }
 0x17b   :  { %407 = vst [vmem:[#allocation5 + $0x30] sm:$0xff] %v397_v45  ;;  %v398_v4 = vadd.f32 %v383_v43, %v358_v8 }
 0x17c   :  { %416 = vst [vmem:[#allocation5 + $0x70] sm:$0xff] %v399_v5  ;;  %v400_v48 = vadd.f32 %v383_v43, %v360_v47 }
 0x17d   :  { %408 = vst [vmem:[#allocation5 + $0x38] sm:$0xff] %v398_v4 }
 0x17e   :  { %417 = vst [vmem:[#allocation5 + $0x78] sm:$0xff] %v400_v48 }
 0x17f   :  { %587 = shalt.err (!%p584_p9)
}
 0x180   :  { %429 = dma.vmem_to_hbm [thread:$0]  %s424_s4, 2048, %s886_s3, [#allocation4], %s601_s15, %s601_s15, %s602_s16  }
 0x181   :  { %598 = dma.done.wait [#allocation4], 2048  }
 0x182   :  { %599 = vsyncadd [#allocation4], 4294965248 }
 0x183   :  { %433 = vsyncpa [#allocation3], 1 }
 0x184   :  { %434 = vsyncpa [#allocation4], 1 }

</bundles_post_ra>
